<compile_context>
chip_gen: v6e
topology: v6e:2x2x1
jax: 0.10.0
libtpu: 0.0.40
codegen_flags: <defaults>
</compile_context>

<pallas_src>
import functools
import itertools

import jax
import jax.numpy as jnp
import numpy as np
from jax.experimental import pallas as pl
from jax.experimental.pallas import tpu as pltpu

BN_EPS = 1e-5
CP = 128          # padded output-channel width (lane-dense stores)


def _round_up(x, m):
    return (x + m - 1) // m * m


# ----------------------------------------------------------------------------
# In-kernel helpers
# ----------------------------------------------------------------------------
def _batchnorm(feat, gamma, beta):
    # nn.BatchNorm1d (default training mode): batch stats over the N sparse
    # points, biased variance, eps=1e-5.  Centered formulation (safe against
    # E[x^2]-E[x]^2 cancellation).  Zero-padded channels stay exactly zero
    # because gamma/beta are zero-padded.
    mu = jnp.mean(feat, axis=0, keepdims=True)
    d = feat - mu
    var = jnp.mean(d * d, axis=0, keepdims=True)
    return d * (gamma * jax.lax.rsqrt(var + BN_EPS)) + beta


# ----------------------------------------------------------------------------
# Kernel 1: conv1 (im2col matmul) + BN1 + ReLU  ->  h [N, CP] bf16
# ----------------------------------------------------------------------------
def conv_bn_relu_kernel(xg_ref, w_ref, g_ref, b_ref, h_ref):
    # One lane-dense MXU matmul: [N, K*Cin_pad] x [K*Cin_pad, CP] -> [N, CP] f32.
    acc = jnp.dot(xg_ref[...], w_ref[...], preferred_element_type=jnp.float32)
    h = _batchnorm(acc, g_ref[...], b_ref[...])
    h_ref[...] = jnp.maximum(h, 0.0).astype(h_ref.dtype)   # bf16 intermediate


# ----------------------------------------------------------------------------
# Kernel 2: conv2 (im2col matmul) + BN2 + shortcut + add + ReLU -> out [N, CP] f32
# ----------------------------------------------------------------------------
def conv_bn_residual_kernel(hg_ref, x_ref, w2_ref, g2_ref, b2_ref,
                            wd_ref, gd_ref, bd_ref, out_ref,
                            *, identity_shortcut: bool):
    y = jnp.dot(hg_ref[...], w2_ref[...], preferred_element_type=jnp.float32)
    y = _batchnorm(y, g2_ref[...], b2_ref[...])

    x = x_ref[...]                                         # [N, CP] f32
    if identity_shortcut:
        ds = x                                             # exact f32 shortcut
    else:
        ds = jnp.dot(x.astype(jnp.bfloat16), wd_ref[...],
                     preferred_element_type=jnp.float32)
        ds = _batchnorm(ds, gd_ref[...], bd_ref[...])

    out_ref[...] = jnp.maximum(y + ds, 0.0)                # lane-dense store


# ----------------------------------------------------------------------------
# Wrapper: layout plumbing (padding / im2col gather) + pallas_calls
# ----------------------------------------------------------------------------
def _vmem_spec():
    return pl.BlockSpec(memory_space=pltpu.MemorySpace.VMEM)


def _pad2(a, rows, cols):
    return jnp.pad(a, ((0, rows - a.shape[0]), (0, cols - a.shape[1])))


def _gather_neighbors(feat, nbr_idx):
    """feat: [N, C]; nbr_idx: [N, K] int32 with sentinel N == 'no neighbor'.
    Returns the im2col operand [N, K*C] with missing-neighbor rows = 0."""
    n, c = feat.shape
    k = nbr_idx.shape[1]
    feat_ext = jnp.concatenate([feat, jnp.zeros((1, c), feat.dtype)], axis=0)
    g = jnp.take(feat_ext, nbr_idx.reshape(-1), axis=0)    # [N*K, C]
    return g.reshape(n, k * c)


@functools.partial(jax.jit, static_argnames=("identity_shortcut",))
def residual_block(x, nbr_idx, p, *, identity_shortcut: bool):
    n, inc = x.shape
    k = nbr_idx.shape[1]
    outc = p["w1"].shape[-1]
    if identity_shortcut:
        assert inc == outc, "identity shortcut requires inc == outc (stride == 1)"

    # Tiny working set at these shapes; re-derive when N-tiling is added (v7x
    # has 64 MiB physical / 32 MiB default scoped VMEM).
    cparams = pltpu.CompilerParams(vmem_limit_bytes=32 * 1024 * 1024)

    # ---- conv1 + BN1 + ReLU --------------------------------------------------
    kc1 = _round_up(k * inc, 128)                     # contraction pad (near-free)
    xg = _gather_neighbors(x, nbr_idx)                # [N, K*inc] f32
    xg = _pad2(xg, n, kc1).astype(jnp.bfloat16)
    w1s = _pad2(p["w1"].reshape(k * inc, outc), kc1, CP).astype(jnp.bfloat16)
    g1 = _pad2(p["g1"], 1, CP)
    b1 = _pad2(p["b1"], 1, CP)

    cost1 = pl.CostEstimate(
        flops=2 * n * kc1 * CP, transcendentals=0,
        bytes_accessed=xg.size * 2 + w1s.size * 2 + (g1.size + b1.size) * 4 + n * CP * 2)
    h = pl.pallas_call(
        conv_bn_relu_kernel,
        out_shape=jax.ShapeDtypeStruct((n, CP), jnp.bfloat16),
        in_specs=[_vmem_spec() for _ in range(4)],
        out_specs=_vmem_spec(),
        compiler_params=cparams,
        cost_estimate=cost1,
    )(xg, w1s, g1, b1)

    # ---- gather conv2 neighborhood at the REAL channel width (XLA glue) -------
    kc2 = _round_up(k * outc, 128)
    hg = _pad2(_gather_neighbors(h[:, :outc], nbr_idx), n, kc2)   # [N, kc2] bf16

    # ---- conv2 + BN2 + shortcut + add + ReLU ----------------------------------
    w2s = _pad2(p["w2"].reshape(k * outc, outc), kc2, CP).astype(jnp.bfloat16)
    g2 = _pad2(p["g2"], 1, CP)
    b2 = _pad2(p["b2"], 1, CP)
    x_pad = _pad2(x, n, CP)                                       # f32 shortcut input
    wd = _pad2(p["wd"], CP, CP).astype(jnp.bfloat16)
    gd = _pad2(p["gd"], 1, CP)
    bd = _pad2(p["bd"], 1, CP)

    cost2 = pl.CostEstimate(
        flops=2 * n * kc2 * CP + (0 if identity_shortcut else 2 * n * CP * CP),
        transcendentals=0,
        bytes_accessed=(hg.size * 2 + w2s.size * 2 + x_pad.size * 4
                        + wd.size * 2 + 6 * CP * 4 + n * CP * 4))
    out = pl.pallas_call(
        functools.partial(conv_bn_residual_kernel,
                          identity_shortcut=identity_shortcut),
        out_shape=jax.ShapeDtypeStruct((n, CP), jnp.float32),
        in_specs=[_vmem_spec() for _ in range(8)],
        out_specs=_vmem_spec(),
        compiler_params=cparams,
        cost_estimate=cost2,
    )(hg, x_pad, w2s, g2, b2, wd, gd, bd)

    return out[:, :outc]          # strip channel padding in the wrapper


# ----------------------------------------------------------------------------
# Glue: neighbor tables from integer voxel coords (stride=1 sparse conv keeps
# the input coordinate set, so output coords == input coords).
# ----------------------------------------------------------------------------
def build_neighbor_indices(coords, ks=3, dilation=1):
    # coords: [N, 4] int32 = (batch, x, y, z).  Returns [N, K] int32 where
    # nbr_idx[j, k] = i with coords[i] == coords[j] + delta_k (same batch),
    # or N (sentinel -> zero contribution) if no such input point exists.
    offs = list(itertools.product(range(-(ks // 2), ks // 2 + 1), repeat=3))
    n = coords.shape[0]
    cj = coords[:, None, 1:]
    ci = coords[None, :, 1:]
    beq = coords[:, None, 0] == coords[None, :, 0]
    cols = []
    for d in offs:
        delta = jnp.asarray(d, jnp.int32) * dilation
        match = jnp.all(ci == cj + delta, axis=-1) & beq          # [N, N]
        has = jnp.any(match, axis=-1)
        cols.append(jnp.where(has, jnp.argmax(match, axis=-1), n))
    return jnp.stack(cols, axis=-1).astype(jnp.int32)             # [N, K]


def build_kernel_maps(coords, ks=3, dilation=1):
    # Dense one-hot maps [K, N, N] — used ONLY by the pure-JAX reference.
    offs = list(itertools.product(range(-(ks // 2), ks // 2 + 1), repeat=3))
    cj = coords[:, None, 1:]
    ci = coords[None, :, 1:]
    beq = coords[:, None, 0] == coords[None, :, 0]
    maps = []
    for d in offs:
        delta = jnp.asarray(d, jnp.int32) * dilation
        maps.append((jnp.all(ci == cj + delta, axis=-1) & beq).astype(jnp.float32))
    return jnp.stack(maps)


def make_params(key, K, inc, outc):
    ks = jax.random.split(key, 7)
    return {
        "w1": 0.1 * jax.random.normal(ks[0], (K, inc, outc), jnp.float32),
        "w2": 0.1 * jax.random.normal(ks[1], (K, outc, outc), jnp.float32),
        "wd": 0.1 * jax.random.normal(ks[2], (inc, outc), jnp.float32),
        "g1": 1.0 + 0.1 * jax.random.normal(ks[3], (1, outc), jnp.float32),
        "b1": 0.1 * jax.random.normal(ks[4], (1, outc), jnp.float32),
        "g2": 1.0 + 0.1 * jax.random.normal(ks[5], (1, outc), jnp.float32),
        "b2": 0.1 * jax.random.normal(ks[6], (1, outc), jnp.float32),
        "gd": jnp.ones((1, outc), jnp.float32),
        "bd": jnp.zeros((1, outc), jnp.float32),
    }


# pure-JAX f32 reference (one-hot formulation) for the correctness check
def ref_block(x, M, p, *, identity_shortcut):
    def conv(f, w):
        return jnp.einsum("kji,ic,kcd->jd", M, f, w)

    def bn(f, g, b):
        mu = f.mean(0, keepdims=True)
        var = ((f - mu) ** 2).mean(0, keepdims=True)
        return (f - mu) / jnp.sqrt(var + BN_EPS) * g + b

    h = jax.nn.relu(bn(conv(x, p["w1"]), p["g1"], p["b1"]))
    y = bn(conv(h, p["w2"]), p["g2"], p["b2"])
    ds = x if identity_shortcut else bn(x @ p["wd"], p["gd"], p["bd"])
    return jax.nn.relu(y + ds)


if __name__ == "__main__":
    key = jax.random.PRNGKey(0)
    k_coord, k_x1, k_p1, k_x2, k_p2 = jax.random.split(key, 5)

    # 2 batches, each a dense 4x4x2 patch of occupied voxels -> N = 64 points
    coords = jnp.asarray(
        [(b, xx, yy, zz)
         for b in range(2) for xx in range(4) for yy in range(4) for zz in range(2)],
        dtype=jnp.int32)                                  # [64, 4]
    N = coords.shape[0]
    ksz, dilation = 3, 1
    K = ksz ** 3
    nbr_idx = build_neighbor_indices(coords, ksz, dilation)   # [64, 27] int32
    M = build_kernel_maps(coords, ksz, dilation)               # reference only

    # Tolerance: kernel uses bf16 MXU inputs / bf16 intermediate (f32
    # accumulation) vs. the f32 reference — this is the intended numerics.
    TOL = dict(rtol=5e-2, atol=5e-2)

    # Case A: inc != outc  -> downsample = Conv3d(k=1) + BN
    inc, outc = 16, 32
    xA = jax.random.normal(k_x1, (N, inc), jnp.float32)
    pA = make_params(k_p1, K, inc, outc)
    outA = jax.block_until_ready(residual_block(xA, nbr_idx, pA, identity_shortcut=False))
    refA = ref_block(xA, M, pA, identity_shortcut=False)
    np.testing.assert_allclose(np.asarray(outA), np.asarray(refA), **TOL)

    # Case B: inc == outc, stride == 1 -> downsample = Identity
    inc_b = outc_b = 32
    xB = jax.random.normal(k_x2, (N, inc_b), jnp.float32)
    pB = make_params(k_p2, K, inc_b, outc_b)
    outB = jax.block_until_ready(residual_block(xB, nbr_idx, pB, identity_shortcut=True))
    refB = ref_block(xB, M, pB, identity_shortcut=True)
    np.testing.assert_allclose(np.asarray(outB), np.asarray(refB), **TOL)

    print("KERNEL_OK")
</pallas_src>

<mosaic_0001>
module attributes {stable_mosaic.version = 11 : i64} {
  func.func @conv_bn_relu_kernel(%arg0: memref<64x512xbf16, #tpu.memory_space<vmem>>, %arg1: memref<512x128xbf16, #tpu.memory_space<vmem>>, %arg2: memref<1x128xf32, #tpu.memory_space<vmem>>, %arg3: memref<1x128xf32, #tpu.memory_space<vmem>>, %arg4: memref<64x128xbf16, #tpu.memory_space<vmem>>) attributes {dimension_semantics = [], scalar_prefetch = 0 : i64, scratch_operands = 0 : i64, tpu.core_type = #tpu.core_type<tc>} {
    %c0 = arith.constant 0 : index
    %c0_0 = arith.constant 0 : index
    %0 = vector.load %arg0[%c0, %c0_0] : memref<64x512xbf16, #tpu.memory_space<vmem>>, vector<64x512xbf16>
    %c0_1 = arith.constant 0 : index
    %c0_2 = arith.constant 0 : index
    %1 = vector.load %arg1[%c0_1, %c0_2] : memref<512x128xbf16, #tpu.memory_space<vmem>>, vector<512x128xbf16>
    %cst = arith.constant dense<0.000000e+00> : vector<64x128xf32>
    %2 = tpu.matmul %0, %1, %cst {dimension_numbers = #tpu.dot_dimension_numbers<[1], [0], [0], [1], [0, 0, 1, 1], [], []>} : vector<64x512xbf16>, vector<512x128xbf16>, vector<64x128xf32> -> vector<64x128xf32>
    %c0_3 = arith.constant 0 : index
    %c0_4 = arith.constant 0 : index
    %3 = vector.load %arg2[%c0_3, %c0_4] : memref<1x128xf32, #tpu.memory_space<vmem>>, vector<1x128xf32>
    %c0_5 = arith.constant 0 : index
    %c0_6 = arith.constant 0 : index
    %4 = vector.load %arg3[%c0_5, %c0_6] : memref<1x128xf32, #tpu.memory_space<vmem>>, vector<1x128xf32>
    %cst_7 = arith.constant dense<0.000000e+00> : vector<128xf32>
    %5 = vector.multi_reduction <add>, %2, %cst_7 [0] : vector<64x128xf32> to vector<128xf32>
    %6 = vector.shape_cast %5 : vector<128xf32> to vector<1x128xf32>
    %cst_8 = arith.constant 6.400000e+01 : f32
    %7 = vector.broadcast %cst_8 : f32 to vector<1x128xf32>
    %8 = arith.divf %6, %7 : vector<1x128xf32>
    %9 = vector.broadcast %8 : vector<1x128xf32> to vector<64x128xf32>
    %10 = arith.subf %2, %9 : vector<64x128xf32>
    %11 = arith.mulf %10, %10 : vector<64x128xf32>
    %cst_9 = arith.constant dense<0.000000e+00> : vector<128xf32>
    %12 = vector.multi_reduction <add>, %11, %cst_9 [0] : vector<64x128xf32> to vector<128xf32>
    %13 = vector.shape_cast %12 : vector<128xf32> to vector<1x128xf32>
    %cst_10 = arith.constant 6.400000e+01 : f32
    %14 = vector.broadcast %cst_10 : f32 to vector<1x128xf32>
    %15 = arith.divf %13, %14 : vector<1x128xf32>
    %cst_11 = arith.constant 9.99999974E-6 : f32
    %16 = vector.broadcast %cst_11 : f32 to vector<1x128xf32>
    %17 = arith.addf %15, %16 : vector<1x128xf32>
    %18 = math.rsqrt %17 : vector<1x128xf32>
    %19 = arith.mulf %3, %18 : vector<1x128xf32>
    %20 = vector.broadcast %19 : vector<1x128xf32> to vector<64x128xf32>
    %21 = arith.mulf %10, %20 : vector<64x128xf32>
    %22 = vector.broadcast %4 : vector<1x128xf32> to vector<64x128xf32>
    %23 = arith.addf %21, %22 : vector<64x128xf32>
    %cst_12 = arith.constant 0.000000e+00 : f32
    %24 = vector.broadcast %cst_12 : f32 to vector<64x128xf32>
    %25 = arith.maximumf %23, %24 : vector<64x128xf32>
    %26 = arith.truncf %25 : vector<64x128xf32> to vector<64x128xbf16>
    %c0_13 = arith.constant 0 : index
    %c0_14 = arith.constant 0 : index
    %27 = vector.load %arg4[%c0_13, %c0_14] : memref<64x128xbf16, #tpu.memory_space<vmem>>, vector<64x128xbf16>
    tpu.vector_store %arg4[%c0_13, %c0_14], %26 {strides = array<i32>} : memref<64x128xbf16, #tpu.memory_space<vmem>>, vector<64x128xbf16>,
    return
  }
}

module attributes {stable_mosaic.version = 11 : i64} {
  func.func @conv_bn_residual_kernel(%arg0: memref<64x896xbf16, #tpu.memory_space<vmem>>, %arg1: memref<64x128xf32, #tpu.memory_space<vmem>>, %arg2: memref<896x128xbf16, #tpu.memory_space<vmem>>, %arg3: memref<1x128xf32, #tpu.memory_space<vmem>>, %arg4: memref<1x128xf32, #tpu.memory_space<vmem>>, %arg5: memref<128x128xbf16, #tpu.memory_space<vmem>>, %arg6: memref<1x128xf32, #tpu.memory_space<vmem>>, %arg7: memref<1x128xf32, #tpu.memory_space<vmem>>, %arg8: memref<64x128xf32, #tpu.memory_space<vmem>>) attributes {dimension_semantics = [], scalar_prefetch = 0 : i64, scratch_operands = 0 : i64, tpu.core_type = #tpu.core_type<tc>} {
    %c0 = arith.constant 0 : index
    %c0_0 = arith.constant 0 : index
    %0 = vector.load %arg0[%c0, %c0_0] : memref<64x896xbf16, #tpu.memory_space<vmem>>, vector<64x896xbf16>
    %c0_1 = arith.constant 0 : index
    %c0_2 = arith.constant 0 : index
    %1 = vector.load %arg2[%c0_1, %c0_2] : memref<896x128xbf16, #tpu.memory_space<vmem>>, vector<896x128xbf16>
    %cst = arith.constant dense<0.000000e+00> : vector<64x128xf32>
    %2 = tpu.matmul %0, %1, %cst {dimension_numbers = #tpu.dot_dimension_numbers<[1], [0], [0], [1], [0, 0, 1, 1], [], []>} : vector<64x896xbf16>, vector<896x128xbf16>, vector<64x128xf32> -> vector<64x128xf32>
    %c0_3 = arith.constant 0 : index
    %c0_4 = arith.constant 0 : index
    %3 = vector.load %arg3[%c0_3, %c0_4] : memref<1x128xf32, #tpu.memory_space<vmem>>, vector<1x128xf32>
    %c0_5 = arith.constant 0 : index
    %c0_6 = arith.constant 0 : index
    %4 = vector.load %arg4[%c0_5, %c0_6] : memref<1x128xf32, #tpu.memory_space<vmem>>, vector<1x128xf32>
    %cst_7 = arith.constant dense<0.000000e+00> : vector<128xf32>
    %5 = vector.multi_reduction <add>, %2, %cst_7 [0] : vector<64x128xf32> to vector<128xf32>
    %6 = vector.shape_cast %5 : vector<128xf32> to vector<1x128xf32>
    %cst_8 = arith.constant 6.400000e+01 : f32
    %7 = vector.broadcast %cst_8 : f32 to vector<1x128xf32>
    %8 = arith.divf %6, %7 : vector<1x128xf32>
    %9 = vector.broadcast %8 : vector<1x128xf32> to vector<64x128xf32>
    %10 = arith.subf %2, %9 : vector<64x128xf32>
    %11 = arith.mulf %10, %10 : vector<64x128xf32>
    %cst_9 = arith.constant dense<0.000000e+00> : vector<128xf32>
    %12 = vector.multi_reduction <add>, %11, %cst_9 [0] : vector<64x128xf32> to vector<128xf32>
    %13 = vector.shape_cast %12 : vector<128xf32> to vector<1x128xf32>
    %cst_10 = arith.constant 6.400000e+01 : f32
    %14 = vector.broadcast %cst_10 : f32 to vector<1x128xf32>
    %15 = arith.divf %13, %14 : vector<1x128xf32>
    %cst_11 = arith.constant 9.99999974E-6 : f32
    %16 = vector.broadcast %cst_11 : f32 to vector<1x128xf32>
    %17 = arith.addf %15, %16 : vector<1x128xf32>
    %18 = math.rsqrt %17 : vector<1x128xf32>
    %19 = arith.mulf %3, %18 : vector<1x128xf32>
    %20 = vector.broadcast %19 : vector<1x128xf32> to vector<64x128xf32>
    %21 = arith.mulf %10, %20 : vector<64x128xf32>
    %22 = vector.broadcast %4 : vector<1x128xf32> to vector<64x128xf32>
    %23 = arith.addf %21, %22 : vector<64x128xf32>
    %c0_12 = arith.constant 0 : index
    %c0_13 = arith.constant 0 : index
    %24 = vector.load %arg1[%c0_12, %c0_13] : memref<64x128xf32, #tpu.memory_space<vmem>>, vector<64x128xf32>
    %25 = arith.truncf %24 : vector<64x128xf32> to vector<64x128xbf16>
    %c0_14 = arith.constant 0 : index
    %c0_15 = arith.constant 0 : index
    %26 = vector.load %arg5[%c0_14, %c0_15] : memref<128x128xbf16, #tpu.memory_space<vmem>>, vector<128x128xbf16>
    %cst_16 = arith.constant dense<0.000000e+00> : vector<64x128xf32>
    %27 = tpu.matmul %25, %26, %cst_16 {dimension_numbers = #tpu.dot_dimension_numbers<[1], [0], [0], [1], [0, 0, 1, 1], [], []>} : vector<64x128xbf16>, vector<128x128xbf16>, vector<64x128xf32> -> vector<64x128xf32>
    %c0_17 = arith.constant 0 : index
    %c0_18 = arith.constant 0 : index
    %28 = vector.load %arg6[%c0_17, %c0_18] : memref<1x128xf32, #tpu.memory_space<vmem>>, vector<1x128xf32>
    %c0_19 = arith.constant 0 : index
    %c0_20 = arith.constant 0 : index
    %29 = vector.load %arg7[%c0_19, %c0_20] : memref<1x128xf32, #tpu.memory_space<vmem>>, vector<1x128xf32>
    %cst_21 = arith.constant dense<0.000000e+00> : vector<128xf32>
    %30 = vector.multi_reduction <add>, %27, %cst_21 [0] : vector<64x128xf32> to vector<128xf32>
    %31 = vector.shape_cast %30 : vector<128xf32> to vector<1x128xf32>
    %cst_22 = arith.constant 6.400000e+01 : f32
    %32 = vector.broadcast %cst_22 : f32 to vector<1x128xf32>
    %33 = arith.divf %31, %32 : vector<1x128xf32>
    %34 = vector.broadcast %33 : vector<1x128xf32> to vector<64x128xf32>
    %35 = arith.subf %27, %34 : vector<64x128xf32>
    %36 = arith.mulf %35, %35 : vector<64x128xf32>
    %cst_23 = arith.constant dense<0.000000e+00> : vector<128xf32>
    %37 = vector.multi_reduction <add>, %36, %cst_23 [0] : vector<64x128xf32> to vector<128xf32>
    %38 = vector.shape_cast %37 : vector<128xf32> to vector<1x128xf32>
    %cst_24 = arith.constant 6.400000e+01 : f32
    %39 = vector.broadcast %cst_24 : f32 to vector<1x128xf32>
    %40 = arith.divf %38, %39 : vector<1x128xf32>
    %cst_25 = arith.constant 9.99999974E-6 : f32
    %41 = vector.broadcast %cst_25 : f32 to vector<1x128xf32>
    %42 = arith.addf %40, %41 : vector<1x128xf32>
    %43 = math.rsqrt %42 : vector<1x128xf32>
    %44 = arith.mulf %28, %43 : vector<1x128xf32>
    %45 = vector.broadcast %44 : vector<1x128xf32> to vector<64x128xf32>
    %46 = arith.mulf %35, %45 : vector<64x128xf32>
    %47 = vector.broadcast %29 : vector<1x128xf32> to vector<64x128xf32>
    %48 = arith.addf %46, %47 : vector<64x128xf32>
    %49 = arith.addf %23, %48 : vector<64x128xf32>
    %cst_26 = arith.constant 0.000000e+00 : f32
    %50 = vector.broadcast %cst_26 : f32 to vector<64x128xf32>
    %51 = arith.maximumf %49, %50 : vector<64x128xf32>
    %c0_27 = arith.constant 0 : index
    %c0_28 = arith.constant 0 : index
    %52 = vector.load %arg8[%c0_27, %c0_28] : memref<64x128xf32, #tpu.memory_space<vmem>>, vector<64x128xf32>
    tpu.vector_store %arg8[%c0_27, %c0_28], %51 {strides = array<i32>} : memref<64x128xf32, #tpu.memory_space<vmem>>, vector<64x128xf32>,
    return
  }
}

</mosaic_0001>

<bundles_post_ra>
// kernel: residual_block.2
= control target key start
LH: loop header
LB: loop body
LE: loop exit
PB: predicated region body
PF: predicated region fallthrough
CT: control target
= control target key end

     0   :  { %s1043_s1 = inlined_call_operand.vmem [shape: bf16[512,128], index: 1, kind: input, shape index: {}]   ;;  %s1044_s0 = inlined_call_operand.vmem [shape: bf16[64,512], index: 0, kind: input, shape index: {}]   ;;  %s1045_s2 = inlined_call_operand.vmem [shape: f32[1,128], index: 2, kind: input, shape index: {}]   ;;  %s1046_s3 = inlined_call_operand.vmem [shape: f32[1,128], index: 3, kind: input, shape index: {}]   ;;  %s1047_s4 = inlined_call_operand.vmem [shape: bf16[64,128], index: 4, kind: output, shape index: {}]  }
   0x1   :  { %v798_v0 = vld [vmem:[%s1043_s1 + $0x78] sm:$0xff]   ;;  %v802_v4 = vld [vmem:[%s1043_s1 + $0x70] sm:$0xff]   ;;  %v806_v8 = vld [vmem:[%s1043_s1 + $0x68] sm:$0xff]  }
   0x2   :  { %v799_v1 = vld [vmem:[%s1043_s1 + $0xf8] sm:$0xff]   ;;  %718 = vmatprep.subr.bf16.mxu0 %v798_v0  ;;  %v803_v5 = vld [vmem:[%s1043_s1 + $0xf0] sm:$0xff]   ;;  %v807_v9 = vld [vmem:[%s1043_s1 + $0xe8] sm:$0xff]  }
   0x3   :  { %v800_v2 = vld [vmem:[%s1043_s1 + $0x38] sm:$0xff]   ;;  %758 = vmatprep.subr.bf16.mxu1 %v799_v1  ;;  %v804_v6 = vld [vmem:[%s1043_s1 + $0x30] sm:$0xff]   ;;  %v808_v10 = vld [vmem:[%s1043_s1 + $0x28] sm:$0xff]  }
   0x4   :  { %v801_v3 = vld [vmem:[%s1043_s1 + $0xb8] sm:$0xff]   ;;  %719 = vmatpush3.bf16.msra.mxu0 %v800_v2  ;;  %v805_v7 = vld [vmem:[%s1043_s1 + $0xb0] sm:$0xff]   ;;  %v809_v11 = vld [vmem:[%s1043_s1 + $0xa8] sm:$0xff]  }
   0x5   :  { %759 = vmatpush3.bf16.msra.mxu1 %v801_v3  ;;  %720 = vmatprep.subr.bf16.mxu0 %v802_v4  ;;  %v810_v12 = vld [vmem:[%s1043_s1 + $0x60] sm:$0xff]   ;;  %v814_v16 = vld [vmem:[%s1043_s1 + $0x58] sm:$0xff]   ;;  %v818_v20 = vld [vmem:[%s1043_s1 + $0x50] sm:$0xff]  }
   0x6   :  { %760 = vmatprep.subr.bf16.mxu1 %v803_v5  ;;  %v811_v13 = vld [vmem:[%s1043_s1 + $0xe0] sm:$0xff]   ;;  %v815_v17 = vld [vmem:[%s1043_s1 + $0xd8] sm:$0xff]   ;;  %v819_v21 = vld [vmem:[%s1043_s1 + $0xd0] sm:$0xff]  }
   0x7   :  { %v812_v14 = vld [vmem:[%s1043_s1 + $0x20] sm:$0xff]   ;;  %v816_v18 = vld [vmem:[%s1043_s1 + $0x18] sm:$0xff]   ;;  %v820_v22 = vld [vmem:[%s1043_s1 + $0x10] sm:$0xff]  }
   0x8   :  { %721 = vmatpush3.bf16.msra.mxu0 %v804_v6  ;;  %v813_v15 = vld [vmem:[%s1043_s1 + $0xa0] sm:$0xff]   ;;  %v817_v19 = vld [vmem:[%s1043_s1 + $0x98] sm:$0xff]   ;;  %v821_v23 = vld [vmem:[%s1043_s1 + $0x90] sm:$0xff]  }
   0x9   :  { %761 = vmatpush3.bf16.msra.mxu1 %v805_v7  ;;  %722 = vmatprep.subr.bf16.mxu0 %v806_v8  ;;  %v822_v24 = vld [vmem:[%s1043_s1 + $0x48] sm:$0xff]   ;;  %v826_v28 = vld [vmem:[%s1043_s1 + $0x40] sm:$0xff]  }
   0xa   :  { %762 = vmatprep.subr.bf16.mxu1 %v807_v9  ;;  %v823_v25 = vld [vmem:[%s1043_s1 + $0xc8] sm:$0xff]   ;;  %v827_v29 = vld [vmem:[%s1043_s1 + $0xc0] sm:$0xff]  }
   0xb   :  { %v824_v26 = vld [vmem:[%s1043_s1 + $0x8] sm:$0xff]   ;;  %v828_v30 = vld [vmem:[%s1043_s1] sm:$0xff]  }
   0xc   :  { %723 = vmatpush3.bf16.msra.mxu0 %v808_v10  ;;  %v825_v27 = vld [vmem:[%s1043_s1 + $0x88] sm:$0xff]   ;;  %v829_v31 = vld [vmem:[%s1043_s1 + $0x80] sm:$0xff]  }
   0xd   :  { %763 = vmatpush3.bf16.msra.mxu1 %v809_v11  ;;  %724 = vmatprep.subr.bf16.mxu0 %v810_v12  ;;  %v830_v32 = vld [vmem:[%s1044_s0] ss:$16 sps:$4 sm:$0xff]   ;;  %v832_v33 = vld [vmem:[%s1044_s0 + $0x4] ss:$16 sps:$4 sm:$0xff]   ;;  %v833_v34 = vld [vmem:[%s1044_s0 + $0x8] ss:$16 sps:$4 sm:$0xff]  }
   0xe   :  { %764 = vmatprep.subr.bf16.mxu1 %v811_v13  ;;  %v835_v35 = vld [vmem:[%s1044_s0 + $0xc] ss:$16 sps:$4 sm:$0xff]   ;;  %402 = vmatprep.mubr.bf16.mxu0 %v832_v33  ;;  %v836_v36 = vld [vmem:[%s1044_s0 + $0x24] ss:$16 sps:$4 sm:$0xff]   ;;  %v840_v38 = vld [vmem:[%s1044_s0 + $0x20] ss:$16 sps:$4 sm:$0xff]  }
   0xf   :  { %467 = vmatprep.mubr.bf16.mxu1 %v835_v35  ;;  %v838_v37 = vld [vmem:[%s1044_s0 + $0x2c] ss:$16 sps:$4 sm:$0xff]   ;;  %v841_v39 = vld [vmem:[%s1044_s0 + $0x28] ss:$16 sps:$4 sm:$0xff]   ;;  %v842_v40 = vld [vmem:[%s1044_s0 + $0x44] ss:$16 sps:$4 sm:$0xff]  }
  0x10   :  { %725 = vmatpush3.bf16.msra.mxu0 %v812_v14  ;;  %v844_v41 = vld [vmem:[%s1044_s0 + $0x4c] ss:$16 sps:$4 sm:$0xff]   ;;  %v846_v42 = vld [vmem:[%s1044_s0 + $0x40] ss:$16 sps:$4 sm:$0xff]   ;;  %v847_v43 = vld [vmem:[%s1044_s0 + $0x48] ss:$16 sps:$4 sm:$0xff]  }
  0x11   :  { %765 = vmatpush3.bf16.msra.mxu1 %v813_v15  ;;  %726 = vmatprep.subr.bf16.mxu0 %v814_v16  ;;  %v848_v44 = vld [vmem:[%s1044_s0 + $0x64] ss:$16 sps:$4 sm:$0xff]   ;;  %v850_v45 = vld [vmem:[%s1044_s0 + $0x6c] ss:$16 sps:$4 sm:$0xff]   ;;  %v852_v46 = vld [vmem:[%s1044_s0 + $0x60] ss:$16 sps:$4 sm:$0xff]  }
  0x12   :  { %766 = vmatprep.subr.bf16.mxu1 %v815_v17  ;;  %v853_v47 = vld [vmem:[%s1044_s0 + $0x68] ss:$16 sps:$4 sm:$0xff]  }
  0x14   :  { %727 = vmatpush3.bf16.msra.mxu0 %v816_v18 }
  0x15   :  { %767 = vmatpush3.bf16.msra.mxu1 %v817_v19  ;;  %728 = vmatprep.subr.bf16.mxu0 %v818_v20 }
  0x16   :  { %768 = vmatprep.subr.bf16.mxu1 %v819_v21 }
  0x18   :  { %729 = vmatpush3.bf16.msra.mxu0 %v820_v22 }
  0x19   :  { %769 = vmatpush3.bf16.msra.mxu1 %v821_v23  ;;  %730 = vmatprep.subr.bf16.mxu0 %v822_v24 }
  0x1a   :  { %770 = vmatprep.subr.bf16.mxu1 %v823_v25 }
  0x1c   :  { %731 = vmatpush3.bf16.msra.mxu0 %v824_v26 }
  0x1d   :  { %771 = vmatpush3.bf16.msra.mxu1 %v825_v27  ;;  %732 = vmatprep.subr.bf16.mxu0 %v826_v28 }
  0x1e   :  { %772 = vmatprep.subr.bf16.mxu1 %v827_v29 }
  0x20   :  { %733 = vmatpush3.bf16.msra.mxu0 %v828_v30 }
  0x21   :  { %773 = vmatpush3.bf16.msra.mxu1 %v829_v31 }
  0x23   :  { %403 = vmatmul.mubr.bf16.vlgmr.msra.gmra.mxu0 %v830_v32 }
  0x24   :  { %468 = vmatmul.mubr.bf16.vlgmr.msra.gmra.mxu1 %v833_v34  ;;  %410 = vmatprep.mubr.bf16.mxu0 %v836_v36 }
  0x25   :  { %475 = vmatprep.mubr.bf16.mxu1 %v838_v37 }
  0x2b   :  { %411 = vmatmul.mubr.bf16.gmra.mxu0 %v840_v38 }
  0x2c   :  { %476 = vmatmul.mubr.bf16.gmra.mxu1 %v841_v39  ;;  %418 = vmatprep.mubr.bf16.mxu0 %v842_v40 }
  0x2d   :  { %483 = vmatprep.mubr.bf16.mxu1 %v844_v41 }
  0x33   :  { %419 = vmatmul.mubr.bf16.gmra.mxu0 %v846_v42 }
  0x34   :  { %484 = vmatmul.mubr.bf16.gmra.mxu1 %v847_v43  ;;  %426 = vmatprep.mubr.bf16.mxu0 %v848_v44 }
  0x35   :  { %491 = vmatprep.mubr.bf16.mxu1 %v850_v45 }
  0x3b   :  { %427 = vmatmul.mubr.bf16.gmra.mxu0 %v852_v46 }
  0x3c   :  { %492 = vmatmul.mubr.bf16.gmra.mxu1 %v853_v47 }
  0xe3   :  { %v734_v48 = vpop.f32.mrf.mxu0 }
  0xe4   :  { %v774_v49 = vpop.f32.mrf.mxu1 }
  0xe5   :  { %v735_v50 = vpop.f32.mrf.mxu0 }
  0xe6   :  { %v775_v51 = vpop.f32.mrf.mxu1  ;;  %v736_v4 = vadd.f32 %v735_v50, %v734_v48 }
  0xe7   :  { %v737_v52 = vpop.f32.mrf.mxu0  ;;  %v776_v5 = vadd.f32 %v775_v51, %v774_v49 }
  0xe8   :  { %v777_v53 = vpop.f32.mrf.mxu1 }
  0xe9   :  { %v738_v54 = vpop.f32.mrf.mxu0  ;;  %v470_v15 = vadd.f32 %v776_v5, %v736_v4 }
  0xea   :  { %v778_v55 = vpop.f32.mrf.mxu1  ;;  %v739_v0 = vadd.f32 %v738_v54, %v737_v52 }
  0xeb   :  { %v740_v56 = vpop.f32.mrf.mxu0  ;;  %v779_v1 = vadd.f32 %v778_v55, %v777_v53 }
  0xec   :  { %v780_v57 = vpop.f32.mrf.mxu1 }
  0xed   :  { %v741_v58 = vpop.f32.mrf.mxu0  ;;  %v473_v10 = vadd.f32 %v779_v1, %v739_v0 }
  0xee   :  { %v781_v59 = vpop.f32.mrf.mxu1  ;;  %v742_v6 = vadd.f32 %v741_v58, %v740_v56 }
  0xef   :  { %v743_v60 = vpop.f32.mrf.mxu0  ;;  %v782_v7 = vadd.f32 %v781_v59, %v780_v57  ;;  %v502_v21 = vadd.f32 %v473_v10, %v470_v15 }
  0xf0   :  { %v783_v61 = vpop.f32.mrf.mxu1 }
  0xf1   :  { %v744_v62 = vpop.f32.mrf.mxu0  ;;  %v478_v16 = vadd.f32 %v782_v7, %v742_v6 }
  0xf2   :  { %v784_v63 = vpop.f32.mrf.mxu1  ;;  %v745_v11 = vadd.f32 %v744_v62, %v743_v60 }
  0xf3   :  { %v746_v2 = vpop.f32.mrf.mxu0  ;;  %v785_v12 = vadd.f32 %v784_v63, %v783_v61  ;;  %v503_v27 = vadd.f32 %v502_v21, %v478_v16  ;;  %v551_v21 = vlaneseq }
  0xf4   :  { %v786_v3 = vpop.f32.mrf.mxu1 }
  0xf5   :  { %v747_v8 = vpop.f32.mrf.mxu0  ;;  %v481_v22 = vadd.f32 %v785_v12, %v745_v11 }
  0xf6   :  { %v787_v9 = vpop.f32.mrf.mxu1  ;;  %v748_v17 = vadd.f32 %v747_v8, %v746_v2 }
  0xf7   :  { %v749_v13 = vpop.f32.mrf.mxu0  ;;  %v788_v18 = vadd.f32 %v787_v9, %v786_v3  ;;  %v504_v32 = vadd.f32 %v503_v27, %v481_v22 }
  0xf8   :  { %v789_v14 = vpop.f32.mrf.mxu1 }
  0xf9   :  { %v750_v19 = vpop.f32.mrf.mxu0  ;;  %v486_v28 = vadd.f32 %v788_v18, %v748_v17 }
  0xfa   :  { %v790_v20 = vpop.f32.mrf.mxu1  ;;  %v751_v23 = vadd.f32 %v750_v19, %v749_v13 }
  0xfb   :  { %v791_v24 = vadd.f32 %v790_v20, %v789_v14  ;;  %v752_v25 = vpop.f32.mrf.mxu0  ;;  %v505_v37 = vadd.f32 %v504_v32, %v486_v28 }
  0xfc   :  { %v792_v26 = vpop.f32.mrf.mxu1 }
  0xfd   :  { %v753_v29 = vpop.f32.mrf.mxu0  ;;  %v489_v33 = vadd.f32 %v791_v24, %v751_v23  ;;  %v500_v23 = vld [vmem:[%s1045_s2] sm:$0x1] }
  0xfe   :  { %v754_v30 = vadd.f32 %v753_v29, %v752_v25  ;;  %v793_v31 = vpop.f32.mrf.mxu1 }
  0xff   :  { %v794_v34 = vadd.f32 %v793_v31, %v792_v26  ;;  %v755_v35 = vpop.f32.mrf.mxu0  ;;  %v506_v42 = vadd.f32 %v505_v37, %v489_v33 }
 0x100   :  { %v795_v36 = vpop.f32.mrf.mxu1 }
 0x101   :  { %v494_v38 = vadd.f32 %v794_v34, %v754_v30  ;;  %v756_v39 = vpop.f32.mrf.mxu0 }
 0x102   :  { %v757_v40 = vadd.f32 %v756_v39, %v755_v35  ;;  %v796_v41 = vpop.f32.mrf.mxu1 }
 0x103   :  { %v797_v43 = vadd.f32 %v796_v41, %v795_v36  ;;  %v507_v44 = vadd.f32 %v506_v42, %v494_v38 }
 0x105   :  { %v497_v45 = vadd.f32 %v797_v43, %v757_v40 }
 0x107   :  { %v508_v46 = vadd.f32 %v507_v44, %v497_v45 }
 0x109   :  { %v509_v47 = vrot.slane %v508_v46, 4 }
 0x10b   :  { %v510_v48 = vadd.f32 %v509_v47, %v508_v46 }
 0x10d   :  { %v511_v49 = vrot.slane %v510_v48, 2 }
 0x10f   :  { %v512_v50 = vadd.f32 %v511_v49, %v510_v48 }
 0x111   :  { %v513_v51 = vrot.slane %v512_v50, 1 }
 0x113   :  { %v514_v52 = vadd.f32 %v513_v51, %v512_v50 }
 0x115   :  { %v516_v53 = vmul.f32 0.015625, %v514_v52 }
 0x117   :  { %v517_v54 = vsub.f32 %v470_v15, %v516_v53  ;;  %v518_v55 = vsub.f32 %v473_v10, %v516_v53  ;;  %v519_v56 = vsub.f32 %v478_v16, %v516_v53  ;;  %v520_v57 = vsub.f32 %v481_v22, %v516_v53 }
 0x118   :  { %v521_v60 = vsub.f32 %v486_v28, %v516_v53  ;;  %v522_v63 = vsub.f32 %v489_v33, %v516_v53  ;;  %v523_v2 = vsub.f32 %v494_v38, %v516_v53  ;;  %v524_v5 = vsub.f32 %v497_v45, %v516_v53  ;;  %v678_v28 = vld [vmem:[%s1046_s3] ss:$0 sm:$0xff] }
 0x119   :  { %v525_v58 = vmul.f32 %v517_v54, %v517_v54  ;;  %v526_v59 = vmul.f32 %v518_v55, %v518_v55  ;;  %v527_v61 = vmul.f32 %v519_v56, %v519_v56  ;;  %v528_v0 = vmul.f32 %v520_v57, %v520_v57 }
 0x11a   :  { %v529_v3 = vmul.f32 %v521_v60, %v521_v60  ;;  %v530_v6 = vmul.f32 %v522_v63, %v522_v63  ;;  %v531_v8 = vmul.f32 %v523_v2, %v523_v2  ;;  %v532_v11 = vmul.f32 %v524_v5, %v524_v5 }
 0x11b   :  { %v533_v62 = vadd.f32 %v526_v59, %v525_v58  ;;  %v552_v22 = vshrl.u32 %v551_v21, 7 }
 0x11d   :  { %v534_v1 = vadd.f32 %v533_v62, %v527_v61  ;;  %v553_v24 = vsub.s32 0, %v552_v22 }
 0x11f   :  { %v535_v4 = vadd.f32 %v534_v1, %v528_v0 }
 0x121   :  { %v536_v7 = vadd.f32 %v535_v4, %v529_v3 }
 0x123   :  { %v537_v9 = vadd.f32 %v536_v7, %v530_v6 }
 0x125   :  { %v538_v10 = vadd.f32 %v537_v9, %v531_v8 }
 0x127   :  { %v539_v12 = vadd.f32 %v538_v10, %v532_v11 }
 0x129   :  { %v540_v13 = vrot.slane %v539_v12, 4 }
 0x12b   :  { %v541_v14 = vadd.f32 %v540_v13, %v539_v12 }
 0x12d   :  { %v542_v15 = vrot.slane %v541_v14, 2 }
 0x12f   :  { %v543_v16 = vadd.f32 %v542_v15, %v541_v14 }
 0x131   :  { %v544_v17 = vrot.slane %v543_v16, 1 }
 0x133   :  { %v545_v18 = vadd.f32 %v544_v17, %v543_v16 }
 0x135   :  { %v546_v19 = vmul.f32 0.015625, %v545_v18 }
 0x137   :  { %v547_v20 = vadd.f32 1e-05, %v546_v19 }
 0x139   :  { %854 = vrsqrt.f32 %v547_v20 }
 0x146   :  { %v855_v25 = vpop.eup %854 }
 0x147   :  { %v549_v26 = vmul.f32 %v855_v25, %v500_v23 }
 0x149   :  { %v554_v27 = vrot.slane %v549_v26, %v553_v24 }
 0x14b   :  { %v556_v29 = vmul.f32 %v554_v27, %v517_v54  ;;  %v557_v30 = vmul.f32 %v554_v27, %v518_v55  ;;  %v558_v31 = vmul.f32 %v554_v27, %v519_v56  ;;  %v559_v32 = vmul.f32 %v554_v27, %v520_v57 }
 0x14c   :  { %v560_v33 = vmul.f32 %v554_v27, %v521_v60  ;;  %v561_v34 = vmul.f32 %v554_v27, %v522_v63  ;;  %v562_v35 = vmul.f32 %v554_v27, %v523_v2  ;;  %v563_v36 = vmul.f32 %v554_v27, %v524_v5 }
 0x14d   :  { %v570_v37 = vadd.f32 %v678_v28, %v556_v29  ;;  %v571_v38 = vadd.f32 %v678_v28, %v557_v30  ;;  %v572_v39 = vadd.f32 %v678_v28, %v558_v31  ;;  %v573_v40 = vadd.f32 %v678_v28, %v559_v32 }
 0x14e   :  { %v574_v41 = vadd.f32 %v678_v28, %v560_v33  ;;  %v575_v42 = vadd.f32 %v678_v28, %v561_v34  ;;  %v576_v43 = vadd.f32 %v678_v28, %v562_v35  ;;  %v577_v44 = vadd.f32 %v678_v28, %v563_v36 }
 0x14f   :  { %v578_v45 = vmax.f32 %v570_v37, 0.0  ;;  %v579_v46 = vmax.f32 %v571_v38, 0.0  ;;  %v580_v47 = vmax.f32 %v572_v39, 0.0  ;;  %v581_v48 = vmax.f32 %v573_v40, 0.0 }
 0x150   :  { %v582_v49 = vmax.f32 %v574_v41, 0.0  ;;  %v583_v50 = vmax.f32 %v575_v42, 0.0  ;;  %v584_v51 = vmax.f32 %v576_v43, 0.0  ;;  %v585_v52 = vmax.f32 %v577_v44, 0.0 }
 0x151   :  { %v698_v53 = vpack.c.bf16 %v579_v46, %v578_v45  ;;  %v703_v54 = vpack.c.bf16 %v581_v48, %v580_v47 }
 0x152   :  { %v708_v55 = vpack.c.bf16 %v583_v50, %v582_v49  ;;  %v713_v56 = vpack.c.bf16 %v585_v52, %v584_v51 }
 0x153   :  { %699 = vst [vmem:[%s1047_s4] sm:$0xff] %v698_v53   ;;  %715 = vst [vmem:[%s1047_s4 + $0x8] sm:$0xff] %v703_v54  }
 0x154   :  { %716 = vst [vmem:[%s1047_s4 + $0x10] sm:$0xff] %v708_v55   ;;  %717 = vst [vmem:[%s1047_s4 + $0x18] sm:$0xff] %v713_v56  }

// kernel: residual_block.3
= control target key start
LH: loop header
LB: loop body
LE: loop exit
PB: predicated region body
PF: predicated region fallthrough
CT: control target
= control target key end

     0   :  { %s2111_s2 = inlined_call_operand.vmem [shape: bf16[896,128], index: 2, kind: input, shape index: {}]   ;;  %s2112_s0 = inlined_call_operand.vmem [shape: bf16[64,896], index: 0, kind: input, shape index: {}]   ;;  %s2113_s5 = inlined_call_operand.vmem [shape: bf16[128,128], index: 5, kind: input, shape index: {}]   ;;  %s2114_s1 = inlined_call_operand.vmem [shape: f32[64,128], index: 1, kind: input, shape index: {}]   ;;  %s2115_s3 = inlined_call_operand.vmem [shape: f32[1,128], index: 3, kind: input, shape index: {}]   ;;  %s2116_s6 = inlined_call_operand.vmem [shape: f32[1,128], index: 6, kind: input, shape index: {}]   ;;  %s2117_s4 = inlined_call_operand.vmem [shape: f32[1,128], index: 4, kind: input, shape index: {}]   ;;  %s2118_s7 = inlined_call_operand.vmem [shape: f32[1,128], index: 7, kind: input, shape index: {}]   ;;  %s2119_s8 = inlined_call_operand.vmem [shape: f32[64,128], index: 8, kind: output, shape index: {}]  }
   0x1   :  { %v1540_v0 = vld [vmem:[%s2111_s2 + $0x78] sm:$0xff]   ;;  %v1544_v4 = vld [vmem:[%s2111_s2 + $0x70] sm:$0xff]   ;;  %v1548_v8 = vld [vmem:[%s2111_s2 + $0x68] sm:$0xff]  }
   0x2   :  { %v1541_v1 = vld [vmem:[%s2111_s2 + $0xf8] sm:$0xff]   ;;  %1332 = vmatprep.subr.bf16.mxu0 %v1540_v0  ;;  %v1545_v5 = vld [vmem:[%s2111_s2 + $0xf0] sm:$0xff]   ;;  %v1549_v9 = vld [vmem:[%s2111_s2 + $0xe8] sm:$0xff]  }
   0x3   :  { %v1542_v2 = vld [vmem:[%s2111_s2 + $0x38] sm:$0xff]   ;;  %1372 = vmatprep.subr.bf16.mxu1 %v1541_v1  ;;  %v1546_v6 = vld [vmem:[%s2111_s2 + $0x30] sm:$0xff]   ;;  %v1550_v10 = vld [vmem:[%s2111_s2 + $0x28] sm:$0xff]  }
   0x4   :  { %v1543_v3 = vld [vmem:[%s2111_s2 + $0xb8] sm:$0xff]   ;;  %1333 = vmatpush3.bf16.msra.mxu0 %v1542_v2  ;;  %v1547_v7 = vld [vmem:[%s2111_s2 + $0xb0] sm:$0xff]   ;;  %v1551_v11 = vld [vmem:[%s2111_s2 + $0xa8] sm:$0xff]  }
   0x5   :  { %1373 = vmatpush3.bf16.msra.mxu1 %v1543_v3  ;;  %1334 = vmatprep.subr.bf16.mxu0 %v1544_v4  ;;  %v1552_v12 = vld [vmem:[%s2111_s2 + $0x60] sm:$0xff]   ;;  %v1556_v16 = vld [vmem:[%s2111_s2 + $0x58] sm:$0xff]   ;;  %v1560_v20 = vld [vmem:[%s2111_s2 + $0x50] sm:$0xff]  }
   0x6   :  { %1374 = vmatprep.subr.bf16.mxu1 %v1545_v5  ;;  %v1553_v13 = vld [vmem:[%s2111_s2 + $0xe0] sm:$0xff]   ;;  %v1557_v17 = vld [vmem:[%s2111_s2 + $0xd8] sm:$0xff]   ;;  %v1561_v21 = vld [vmem:[%s2111_s2 + $0xd0] sm:$0xff]  }
   0x7   :  { %v1554_v14 = vld [vmem:[%s2111_s2 + $0x20] sm:$0xff]   ;;  %v1558_v18 = vld [vmem:[%s2111_s2 + $0x18] sm:$0xff]   ;;  %v1562_v22 = vld [vmem:[%s2111_s2 + $0x10] sm:$0xff]  }
   0x8   :  { %1335 = vmatpush3.bf16.msra.mxu0 %v1546_v6  ;;  %v1555_v15 = vld [vmem:[%s2111_s2 + $0xa0] sm:$0xff]   ;;  %v1559_v19 = vld [vmem:[%s2111_s2 + $0x98] sm:$0xff]   ;;  %v1563_v23 = vld [vmem:[%s2111_s2 + $0x90] sm:$0xff]  }
   0x9   :  { %1375 = vmatpush3.bf16.msra.mxu1 %v1547_v7  ;;  %1336 = vmatprep.subr.bf16.mxu0 %v1548_v8  ;;  %v1564_v24 = vld [vmem:[%s2111_s2 + $0x48] sm:$0xff]   ;;  %v1568_v28 = vld [vmem:[%s2111_s2 + $0x40] sm:$0xff]   ;;  %v1578_v36 = vld [vmem:[%s2111_s2 + $0x178] sm:$0xff]  }
   0xa   :  { %1376 = vmatprep.subr.bf16.mxu1 %v1549_v9  ;;  %v1565_v25 = vld [vmem:[%s2111_s2 + $0xc8] sm:$0xff]   ;;  %v1569_v29 = vld [vmem:[%s2111_s2 + $0xc0] sm:$0xff]   ;;  %v1579_v37 = vld [vmem:[%s2111_s2 + $0x138] sm:$0xff]  }
   0xb   :  { %v1566_v26 = vld [vmem:[%s2111_s2 + $0x8] sm:$0xff]   ;;  %v1570_v30 = vld [vmem:[%s2111_s2] sm:$0xff]   ;;  %v1580_v38 = vld [vmem:[%s2111_s2 + $0x1b8] sm:$0xff]  }
   0xc   :  { %1337 = vmatpush3.bf16.msra.mxu0 %v1550_v10  ;;  %v1567_v27 = vld [vmem:[%s2111_s2 + $0x88] sm:$0xff]   ;;  %v1571_v31 = vld [vmem:[%s2111_s2 + $0x80] sm:$0xff]   ;;  %v1581_v39 = vld [vmem:[%s2111_s2 + $0x170] sm:$0xff]  }
   0xd   :  { %1377 = vmatpush3.bf16.msra.mxu1 %v1551_v11  ;;  %1338 = vmatprep.subr.bf16.mxu0 %v1552_v12  ;;  %v1572_v32 = vld [vmem:[%s2112_s0] ss:$28 sps:$4 sm:$0xff]   ;;  %v1575_v34 = vld [vmem:[%s2112_s0 + $0x8] ss:$28 sps:$4 sm:$0xff]   ;;  %v1582_v40 = vld [vmem:[%s2111_s2 + $0x130] sm:$0xff]  }
   0xe   :  { %1378 = vmatprep.subr.bf16.mxu1 %v1553_v13  ;;  %v1574_v33 = vld [vmem:[%s2112_s0 + $0x4] ss:$28 sps:$4 sm:$0xff]   ;;  %v1577_v35 = vld [vmem:[%s2112_s0 + $0xc] ss:$28 sps:$4 sm:$0xff]   ;;  %v1583_v41 = vld [vmem:[%s2112_s0 + $0x3c] ss:$28 sps:$4 sm:$0xff]  }
   0xf   :  { %686 = vmatprep.mubr.bf16.mxu0 %v1574_v33  ;;  %751 = vmatprep.mubr.bf16.mxu1 %v1577_v35  ;;  %v1585_v42 = vld [vmem:[%s2112_s0 + $0x44] ss:$28 sps:$4 sm:$0xff]   ;;  %v1587_v43 = vld [vmem:[%s2111_s2 + $0x1b0] sm:$0xff]   ;;  %v1590_v46 = vld [vmem:[%s2111_s2 + $0x168] sm:$0xff]  }
  0x10   :  { %1339 = vmatpush3.bf16.msra.mxu0 %v1554_v14  ;;  %v1588_v44 = vld [vmem:[%s2112_s0 + $0x38] ss:$28 sps:$4 sm:$0xff]   ;;  %v1589_v45 = vld [vmem:[%s2112_s0 + $0x40] ss:$28 sps:$4 sm:$0xff]   ;;  %v1591_v47 = vld [vmem:[%s2111_s2 + $0x128] sm:$0xff]  }
  0x11   :  { %1379 = vmatpush3.bf16.msra.mxu1 %v1555_v15  ;;  %1340 = vmatprep.subr.bf16.mxu0 %v1556_v16  ;;  %v1592_v48 = vld [vmem:[%s2111_s2 + $0x1a8] sm:$0xff]   ;;  %v1593_v49 = vld [vmem:[%s2111_s2 + $0x160] sm:$0xff]   ;;  %v1595_v51 = vld [vmem:[%s2112_s0 + $0x74] ss:$28 sps:$4 sm:$0xff]  }
  0x12   :  { %1380 = vmatprep.subr.bf16.mxu1 %v1557_v17  ;;  %v1594_v50 = vld [vmem:[%s2111_s2 + $0x120] sm:$0xff]   ;;  %v1597_v52 = vld [vmem:[%s2112_s0 + $0x7c] ss:$28 sps:$4 sm:$0xff]   ;;  %v1600_v54 = vld [vmem:[%s2112_s0 + $0x70] ss:$28 sps:$4 sm:$0xff]  }
  0x13   :  { %v1599_v53 = vld [vmem:[%s2111_s2 + $0x1a0] sm:$0xff]   ;;  %v1601_v55 = vld [vmem:[%s2112_s0 + $0x78] ss:$28 sps:$4 sm:$0xff]   ;;  %v1607_v61 = vld [vmem:[%s2112_s0 + $0xac] ss:$28 sps:$4 sm:$0xff]  }
  0x14   :  { %1341 = vmatpush3.bf16.msra.mxu0 %v1558_v18  ;;  %v1602_v56 = vld [vmem:[%s2111_s2 + $0x158] sm:$0xff]   ;;  %v1605_v59 = vld [vmem:[%s2111_s2 + $0x150] sm:$0xff]   ;;  %v1612_v0 = vld [vmem:[%s2112_s0 + $0xa8] ss:$28 sps:$4 sm:$0xff]  }
  0x15   :  { %1381 = vmatpush3.bf16.msra.mxu1 %v1559_v19  ;;  %1342 = vmatprep.subr.bf16.mxu0 %v1560_v20  ;;  %v1603_v57 = vld [vmem:[%s2111_s2 + $0x118] sm:$0xff]   ;;  %v1606_v60 = vld [vmem:[%s2111_s2 + $0x110] sm:$0xff]   ;;  %v1614_v2 = vld [vmem:[%s2111_s2 + $0x148] sm:$0xff]  }
  0x16   :  { %1382 = vmatprep.subr.bf16.mxu1 %v1561_v21  ;;  %v1604_v58 = vld [vmem:[%s2111_s2 + $0x198] sm:$0xff]   ;;  %v1609_v62 = vld [vmem:[%s2112_s0 + $0xb4] ss:$28 sps:$4 sm:$0xff]   ;;  %v1615_v3 = vld [vmem:[%s2111_s2 + $0x108] sm:$0xff]  }
  0x17   :  { %v1611_v63 = vld [vmem:[%s2111_s2 + $0x190] sm:$0xff]   ;;  %v1616_v4 = vld [vmem:[%s2111_s2 + $0x188] sm:$0xff]   ;;  %v1617_v5 = vld [vmem:[%s2111_s2 + $0x140] sm:$0xff]  }
  0x18   :  { %1343 = vmatpush3.bf16.msra.mxu0 %v1562_v22  ;;  %v1613_v1 = vld [vmem:[%s2112_s0 + $0xb0] ss:$28 sps:$4 sm:$0xff]   ;;  %v1618_v6 = vld [vmem:[%s2111_s2 + $0x100] sm:$0xff]   ;;  %v1623_v10 = vld [vmem:[%s2113_s5 + $0x38] sm:$0xff]  }
  0x19   :  { %1383 = vmatpush3.bf16.msra.mxu1 %v1563_v23  ;;  %1344 = vmatprep.subr.bf16.mxu0 %v1564_v24  ;;  %v1619_v7 = vld [vmem:[%s2112_s0 + $0x10] ss:$28 sps:$4 sm:$0xff]   ;;  %v1622_v9 = vld [vmem:[%s2111_s2 + $0x180] sm:$0xff]   ;;  %v1624_v11 = vld [vmem:[%s2112_s0 + $0x18] ss:$28 sps:$4 sm:$0xff]  }
  0x1a   :  { %1384 = vmatprep.subr.bf16.mxu1 %v1565_v25  ;;  %v1621_v8 = vld [vmem:[%s2112_s0 + $0x14] ss:$28 sps:$4 sm:$0xff]   ;;  %v1627_v14 = vld [vmem:[%s2112_s0 + $0x4c] ss:$28 sps:$4 sm:$0xff]   ;;  %v1631_v17 = vld [vmem:[%s2113_s5 + $0x20] sm:$0xff]  }
  0x1b   :  { %v1625_v12 = vld [vmem:[%s2112_s0 + $0x50] ss:$28 sps:$4 sm:$0xff]   ;;  %v1629_v16 = vld [vmem:[%s2112_s0 + $0x48] ss:$28 sps:$4 sm:$0xff]   ;;  %v1635_v20 = vld [vmem:[%s2113_s5 + $0x18] sm:$0xff]  }
  0x1c   :  { %1345 = vmatpush3.bf16.msra.mxu0 %v1566_v26  ;;  %v1626_v13 = vld [vmem:[%s2113_s5 + $0x30] sm:$0xff]   ;;  %v1630_v15 = vld [vmem:[%s2113_s5 + $0x28] sm:$0xff]   ;;  %v1632_v18 = vld [vmem:[%s2112_s0 + $0x84] ss:$28 sps:$4 sm:$0xff]  }
  0x1d   :  { %1385 = vmatpush3.bf16.msra.mxu1 %v1567_v27  ;;  %1346 = vmatprep.subr.bf16.mxu0 %v1568_v28  ;;  %v1636_v19 = vld [vmem:[%s2112_s0 + $0x88] ss:$28 sps:$4 sm:$0xff]   ;;  %v1637_v21 = vld [vmem:[%s2112_s0 + $0xc0] ss:$28 sps:$4 sm:$0xff]   ;;  %v1638_v23 = vld [vmem:[%s2113_s5 + $0x10] sm:$0xff]  }
  0x1e   :  { %1386 = vmatprep.subr.bf16.mxu1 %v1569_v29  ;;  %v1634_v22 = vld [vmem:[%s2112_s0 + $0x80] ss:$28 sps:$4 sm:$0xff]   ;;  %v997_v26 = vld [vmem:[%s2114_s1 + $0x28] sm:$0xff] }
  0x1f   :  { %v1639_v24 = vld [vmem:[%s2112_s0 + $0xbc] ss:$28 sps:$4 sm:$0xff]   ;;  %v996_v25 = vld [vmem:[%s2114_s1 + $0x20] sm:$0xff]  ;;  %v1642_v28 = vld [vmem:[%s2113_s5 + $0x8] sm:$0xff]  }
  0x20   :  { %1347 = vmatpush3.bf16.msra.mxu0 %v1570_v30  ;;  %v1002_v27 = vpack.c.bf16 %v997_v26, %v996_v25  ;;  %v992_v29 = vld [vmem:[%s2114_s1] sm:$0xff]  ;;  %v993_v30 = vld [vmem:[%s2114_s1 + $0x8] sm:$0xff]  ;;  %v995_v35 = vld [vmem:[%s2114_s1 + $0x18] sm:$0xff] }
  0x21   :  { %1387 = vmatpush3.bf16.msra.mxu1 %v1571_v31  ;;  %1412 = vmatprep.subr.bf16.mxu0 %v1578_v36  ;;  %v1641_v31 = vld [vmem:[%s2112_s0 + $0xb8] ss:$28 sps:$4 sm:$0xff]   ;;  %v1000_v33 = vpack.c.bf16 %v993_v30, %v992_v29 }
  0x22   :  { %1476 = vmatprep.subr.bf16.mxu1 %v1580_v38 }
  0x23   :  { %687 = vmatmul.mubr.bf16.vlgmr.msra.gmra.mxu0 %v1572_v32  ;;  %v1643_v32 = vld [vmem:[%s2113_s5] sm:$0xff]  }
  0x24   :  { %752 = vmatmul.mubr.bf16.vlgmr.msra.gmra.mxu1 %v1575_v34  ;;  %1413 = vmatpush3.bf16.msra.mxu0 %v1579_v37  ;;  %v994_v34 = vld [vmem:[%s2114_s1 + $0x10] sm:$0xff] }
  0x25   :  { %1414 = vmatprep.subr.bf16.mxu0 %v1581_v39  ;;  %1477 = vmatpush3.bf16.msra.mxu1 %v1580_v38  ;;  %v1001_v36 = vpack.c.bf16 %v995_v35, %v994_v34  ;;  %v998_v37 = vld [vmem:[%s2114_s1 + $0x30] sm:$0xff]  ;;  %v999_v38 = vld [vmem:[%s2114_s1 + $0x38] sm:$0xff] }
  0x26   :  { %694 = vmatprep.mubr.bf16.mxu0 %v1583_v41  ;;  %759 = vmatprep.mubr.bf16.mxu1 %v1585_v42  ;;  %v1003_v39 = vpack.c.bf16 %v999_v38, %v998_v37 }
  0x27   :  { %1478 = vmatprep.subr.bf16.mxu1 %v1587_v43 }
  0x28   :  { %1415 = vmatpush3.bf16.msra.mxu0 %v1582_v40 }
  0x29   :  { %1416 = vmatprep.subr.bf16.mxu0 %v1590_v46  ;;  %1479 = vmatpush3.bf16.msra.mxu1 %v1587_v43 }
  0x2a   :  { %1480 = vmatprep.subr.bf16.mxu1 %v1592_v48 }
  0x2b   :  { %695 = vmatmul.mubr.bf16.gmra.mxu0 %v1588_v44 }
  0x2c   :  { %760 = vmatmul.mubr.bf16.gmra.mxu1 %v1589_v45  ;;  %1417 = vmatpush3.bf16.msra.mxu0 %v1591_v47 }
  0x2d   :  { %1418 = vmatprep.subr.bf16.mxu0 %v1593_v49  ;;  %1481 = vmatpush3.bf16.msra.mxu1 %v1592_v48 }
  0x2e   :  { %702 = vmatprep.mubr.bf16.mxu0 %v1595_v51  ;;  %767 = vmatprep.mubr.bf16.mxu1 %v1597_v52 }
  0x2f   :  { %1482 = vmatprep.subr.bf16.mxu1 %v1599_v53 }
  0x30   :  { %1419 = vmatpush3.bf16.msra.mxu0 %v1594_v50 }
  0x31   :  { %1420 = vmatprep.subr.bf16.mxu0 %v1602_v56  ;;  %1483 = vmatpush3.bf16.msra.mxu1 %v1599_v53 }
  0x32   :  { %1484 = vmatprep.subr.bf16.mxu1 %v1604_v58 }
  0x33   :  { %703 = vmatmul.mubr.bf16.gmra.mxu0 %v1600_v54 }
  0x34   :  { %768 = vmatmul.mubr.bf16.gmra.mxu1 %v1601_v55  ;;  %1421 = vmatpush3.bf16.msra.mxu0 %v1603_v57 }
  0x35   :  { %1422 = vmatprep.subr.bf16.mxu0 %v1605_v59  ;;  %1485 = vmatpush3.bf16.msra.mxu1 %v1604_v58 }
  0x36   :  { %710 = vmatprep.mubr.bf16.mxu0 %v1607_v61  ;;  %775 = vmatprep.mubr.bf16.mxu1 %v1609_v62 }
  0x37   :  { %1486 = vmatprep.subr.bf16.mxu1 %v1611_v63 }
  0x38   :  { %1423 = vmatpush3.bf16.msra.mxu0 %v1606_v60 }
  0x39   :  { %1424 = vmatprep.subr.bf16.mxu0 %v1614_v2  ;;  %1487 = vmatpush3.bf16.msra.mxu1 %v1611_v63 }
  0x3a   :  { %1488 = vmatprep.subr.bf16.mxu1 %v1616_v4 }
  0x3b   :  { %711 = vmatmul.mubr.bf16.gmra.mxu0 %v1612_v0 }
  0x3c   :  { %776 = vmatmul.mubr.bf16.gmra.mxu1 %v1613_v1  ;;  %1425 = vmatpush3.bf16.msra.mxu0 %v1615_v3 }
  0x3d   :  { %1426 = vmatprep.subr.bf16.mxu0 %v1617_v5  ;;  %1489 = vmatpush3.bf16.msra.mxu1 %v1616_v4 }
  0x3e   :  { %816 = vmatprep.mubr.bf16.mxu0 %v1621_v8  ;;  %1490 = vmatprep.subr.bf16.mxu1 %v1622_v9 }
  0x3f   :  { %1492 = vmatprep.mubr.bf16.mxu1 %v1624_v11 }
  0x40   :  { %1427 = vmatpush3.bf16.msra.mxu0 %v1618_v6 }
  0x41   :  { %1500 = vmatprep.subr.bf16.mxu0 %v1623_v10  ;;  %1491 = vmatpush3.bf16.msra.mxu1 %v1622_v9 }
  0x42   :  { %1524 = vmatprep.subr.bf16.mxu1 %v1623_v10 }
  0x43   :  { %817 = vmatmul.mubr.bf16.vlgmr.msra.gmra.mxu0 %v1619_v7 }
  0x44   :  { %1501 = vmatpush3.bf16.msra.mxu0 %v1623_v10  ;;  %1493 = vmatmul.mubr.bf16.vlgmr.msra.gmra.mxu1 %v1625_v12 }
  0x45   :  { %1502 = vmatprep.subr.bf16.mxu0 %v1626_v13  ;;  %824 = vmatprep.mubr.bf16.mxu0 %v1627_v14 }
  0x46   :  { %1532 = vmatpush3.bf16.msra.mxu1 %v1623_v10  ;;  %1496 = vmatprep.mubr.bf16.mxu1 %v1636_v19 }
  0x47   :  { %1525 = vmatprep.subr.bf16.mxu1 %v1626_v13 }
  0x48   :  { %1503 = vmatpush3.bf16.msra.mxu0 %v1626_v13 }
  0x49   :  { %1504 = vmatprep.subr.bf16.mxu0 %v1630_v15 }
  0x4a   :  { %1533 = vmatpush3.bf16.msra.mxu1 %v1626_v13 }
  0x4b   :  { %825 = vmatmul.mubr.bf16.gmra.mxu0 %v1629_v16  ;;  %1526 = vmatprep.subr.bf16.mxu1 %v1630_v15 }
  0x4c   :  { %1505 = vmatpush3.bf16.msra.mxu0 %v1630_v15  ;;  %832 = vmatprep.mubr.bf16.mxu0 %v1632_v18 }
  0x4d   :  { %1506 = vmatprep.subr.bf16.mxu0 %v1631_v17  ;;  %1497 = vmatmul.mubr.bf16.gmra.mxu1 %v1637_v21 }
  0x4e   :  { %1534 = vmatpush3.bf16.msra.mxu1 %v1630_v15  ;;  %1520 = vmatprep.mubr.bf16.mxu1 %v1002_v27 }
  0x4f   :  { %1527 = vmatprep.subr.bf16.mxu1 %v1631_v17 }
  0x50   :  { %1507 = vmatpush3.bf16.msra.mxu0 %v1631_v17 }
  0x51   :  { %1508 = vmatprep.subr.bf16.mxu0 %v1635_v20 }
  0x52   :  { %1535 = vmatpush3.bf16.msra.mxu1 %v1631_v17 }
  0x53   :  { %833 = vmatmul.mubr.bf16.gmra.mxu0 %v1634_v22  ;;  %1528 = vmatprep.subr.bf16.mxu1 %v1635_v20 }
  0x54   :  { %1509 = vmatpush3.bf16.msra.mxu0 %v1635_v20  ;;  %840 = vmatprep.mubr.bf16.mxu0 %v1639_v24 }
  0x55   :  { %1510 = vmatprep.subr.bf16.mxu0 %v1638_v23 }
  0x56   :  { %1536 = vmatpush3.bf16.msra.mxu1 %v1635_v20 }
  0x57   :  { %1529 = vmatprep.subr.bf16.mxu1 %v1638_v23 }
  0x58   :  { %1511 = vmatpush3.bf16.msra.mxu0 %v1638_v23 }
  0x59   :  { %1512 = vmatprep.subr.bf16.mxu0 %v1642_v28 }
  0x5a   :  { %1537 = vmatpush3.bf16.msra.mxu1 %v1638_v23 }
  0x5b   :  { %841 = vmatmul.mubr.bf16.gmra.mxu0 %v1641_v31  ;;  %1530 = vmatprep.subr.bf16.mxu1 %v1642_v28 }
  0x5c   :  { %1513 = vmatpush3.bf16.msra.mxu0 %v1642_v28  ;;  %1516 = vmatprep.mubr.bf16.mxu0 %v1000_v33 }
  0x5d   :  { %1514 = vmatprep.subr.bf16.mxu0 %v1643_v32 }
  0x5e   :  { %1538 = vmatpush3.bf16.msra.mxu1 %v1642_v28 }
  0x5f   :  { %1531 = vmatprep.subr.bf16.mxu1 %v1643_v32 }
  0x60   :  { %1515 = vmatpush3.bf16.msra.mxu0 %v1643_v32 }
  0x62   :  { %1539 = vmatpush3.bf16.msra.mxu1 %v1643_v32 }
  0x63   :  { %1517 = vmatmul.mubr.bf16.vlgmr.msra.gmra.mxu0 %v1001_v36 }
  0x65   :  { %1521 = vmatmul.mubr.bf16.vlgmr.msra.gmra.mxu1 %v1003_v39 }
  0xe3   :  { %v1348_v40 = vpop.f32.mrf.mxu0 }
  0xe4   :  { %v1388_v41 = vpop.f32.mrf.mxu1 }
  0xe5   :  { %v1349_v42 = vpop.f32.mrf.mxu0 }
  0xe6   :  { %v1389_v43 = vpop.f32.mrf.mxu1  ;;  %v1350_v19 = vadd.f32 %v1349_v42, %v1348_v40 }
  0xe7   :  { %v1351_v44 = vpop.f32.mrf.mxu0  ;;  %v1390_v20 = vadd.f32 %v1389_v43, %v1388_v41 }
  0xe8   :  { %v1391_v45 = vpop.f32.mrf.mxu1 }
  0xe9   :  { %v1352_v46 = vpop.f32.mrf.mxu0  ;;  %v754_v33 = vadd.f32 %v1390_v20, %v1350_v19 }
  0xea   :  { %v1392_v47 = vpop.f32.mrf.mxu1  ;;  %v1353_v16 = vadd.f32 %v1352_v46, %v1351_v44 }
  0xeb   :  { %v1354_v48 = vpop.f32.mrf.mxu0  ;;  %v1393_v17 = vadd.f32 %v1392_v47, %v1391_v45 }
  0xec   :  { %v1394_v49 = vpop.f32.mrf.mxu1 }
  0xed   :  { %v1355_v50 = vpop.f32.mrf.mxu0  ;;  %v757_v26 = vadd.f32 %v1393_v17, %v1353_v16 }
  0xee   :  { %v1395_v51 = vpop.f32.mrf.mxu1  ;;  %v1356_v21 = vadd.f32 %v1355_v50, %v1354_v48 }
  0xef   :  { %v1357_v52 = vpop.f32.mrf.mxu0  ;;  %v1396_v22 = vadd.f32 %v1395_v51, %v1394_v49 }
  0xf0   :  { %v1397_v53 = vpop.f32.mrf.mxu1 }
  0xf1   :  { %v1358_v54 = vpop.f32.mrf.mxu0  ;;  %v762_v34 = vadd.f32 %v1396_v22, %v1356_v21 }
  0xf2   :  { %v1398_v55 = vpop.f32.mrf.mxu1  ;;  %v1359_v29 = vadd.f32 %v1358_v54, %v1357_v52 }
  0xf3   :  { %v1360_v56 = vpop.f32.mrf.mxu0  ;;  %v1399_v30 = vadd.f32 %v1398_v55, %v1397_v53 }
  0xf4   :  { %v1400_v57 = vpop.f32.mrf.mxu1 }
  0xf5   :  { %v1361_v58 = vpop.f32.mrf.mxu0  ;;  %v765_v44 = vadd.f32 %v1399_v30, %v1359_v29 }
  0xf6   :  { %v1401_v59 = vpop.f32.mrf.mxu1  ;;  %v1362_v36 = vadd.f32 %v1361_v58, %v1360_v56 }
  0xf7   :  { %v1363_v60 = vpop.f32.mrf.mxu0  ;;  %v1402_v37 = vadd.f32 %v1401_v59, %v1400_v57 }
  0xf8   :  { %v1403_v61 = vpop.f32.mrf.mxu1 }
  0xf9   :  { %v1364_v62 = vpop.f32.mrf.mxu0  ;;  %v770_v49 = vadd.f32 %v1402_v37, %v1362_v36 }
  0xfa   :  { %v1404_v63 = vpop.f32.mrf.mxu1  ;;  %v1365_v40 = vadd.f32 %v1364_v62, %v1363_v60 }
  0xfb   :  { %v1366_v0 = vpop.f32.mrf.mxu0  ;;  %v1405_v41 = vadd.f32 %v1404_v63, %v1403_v61 }
  0xfc   :  { %v1406_v1 = vpop.f32.mrf.mxu1 }
  0xfd   :  { %v1367_v2 = vpop.f32.mrf.mxu0  ;;  %v773_v52 = vadd.f32 %v1405_v41, %v1365_v40 }
  0xfe   :  { %v1407_v3 = vpop.f32.mrf.mxu1  ;;  %v1368_v53 = vadd.f32 %v1367_v2, %v1366_v0 }
  0xff   :  { %v1369_v4 = vpop.f32.mrf.mxu0  ;;  %v1408_v54 = vadd.f32 %v1407_v3, %v1406_v1 }
 0x100   :  { %v1993_v5 = vpop.f32.mrf.mxu1 }
 0x101   :  { %v1370_v6 = vpop.f32.mrf.mxu0 }
 0x102   :  { %v1410_v8 = vpop.f32.mrf.mxu1 }
 0x103   :  { %v1428_v7 = vpop.f32.mrf.mxu0  ;;  %v1411_v16 = vadd.f32 %v1410_v8, %v1993_v5 }
 0x104   :  { %v1494_v10 = vpop.f32.mrf.mxu1 }
 0x105   :  { %v1429_v9 = vpop.f32.mrf.mxu0 }
 0x106   :  { %v883_v12 = vpop.f32.mrf.mxu1  ;;  %v1430_v31 = vadd.f32 %v1429_v9, %v1428_v7  ;;  %v778_v9 = vadd.f32 %v1408_v54, %v1368_v53 }
 0x107   :  { %v1431_v11 = vpop.f32.mrf.mxu0 }
 0x108   :  { %v1495_v15 = vpop.f32.mrf.mxu1  ;;  %v819_v45 = vadd.f32 %v1430_v31, %v754_v33 }
 0x109   :  { %v1432_v13 = vpop.f32.mrf.mxu0 }
 0x10a   :  { %v886_v23 = vpop.f32.mrf.mxu1  ;;  %v1433_v25 = vadd.f32 %v1432_v13, %v1431_v11  ;;  %v884_v57 = vadd.f32 %v883_v12, %v819_v45  ;;  %v1371_v11 = vadd.f32 %v1370_v6, %v1369_v4 }
 0x10b   :  { %v1434_v14 = vpop.f32.mrf.mxu0 }
 0x10c   :  { %v822_v38 = vadd.f32 %v1433_v25, %v757_v26  ;;  %v781_v19 = vadd.f32 %v1411_v16, %v1371_v11 }
 0x10d   :  { %v1435_v18 = vpop.f32.mrf.mxu0  ;;  %v1498_v28 = vpop.f32.mrf.mxu1 }
 0x10e   :  { %v1436_v32 = vadd.f32 %v1435_v18, %v1434_v14  ;;  %v887_v50 = vadd.f32 %v886_v23, %v822_v38 }
 0x10f   :  { %v1437_v24 = vpop.f32.mrf.mxu0  ;;  %v899_v43 = vpop.f32.mrf.mxu1 }
 0x110   :  { %v827_v46 = vadd.f32 %v1436_v32, %v762_v34  ;;  %v916_v62 = vadd.f32 %v887_v50, %v884_v57 }
 0x111   :  { %v1438_v27 = vpop.f32.mrf.mxu0  ;;  %v1499_v56 = vpop.f32.mrf.mxu1 }
 0x112   :  { %v1439_v39 = vadd.f32 %v1438_v27, %v1437_v24  ;;  %v892_v58 = vadd.f32 %v1494_v10, %v827_v46 }
 0x113   :  { %v1440_v35 = vpop.f32.mrf.mxu0  ;;  %v902_v14 = vpop.f32.mrf.mxu1 }
 0x114   :  { %v830_v51 = vadd.f32 %v1439_v39, %v765_v44  ;;  %v917_v17 = vadd.f32 %v916_v62, %v892_v58 }
 0x115   :  { %v1441_v42 = vpop.f32.mrf.mxu0 }
 0x116   :  { %v1442_v47 = vadd.f32 %v1441_v42, %v1440_v35  ;;  %v895_v63 = vadd.f32 %v1495_v15, %v830_v51 }
 0x117   :  { %v1443_v48 = vpop.f32.mrf.mxu0 }
 0x118   :  { %v835_v60 = vadd.f32 %v1442_v47, %v770_v49  ;;  %v918_v2 = vadd.f32 %v917_v17, %v895_v63 }
 0x119   :  { %v1444_v55 = vpop.f32.mrf.mxu0 }
 0x11a   :  { %v1445_v59 = vadd.f32 %v1444_v55, %v1443_v48  ;;  %v900_v18 = vadd.f32 %v899_v43, %v835_v60 }
 0x11b   :  { %v1446_v61 = vpop.f32.mrf.mxu0 }
 0x11c   :  { %v838_v7 = vadd.f32 %v1445_v59, %v773_v52  ;;  %v919_v20 = vadd.f32 %v918_v2, %v900_v18 }
 0x11d   :  { %v1447_v13 = vpop.f32.mrf.mxu0 }
 0x11e   :  { %v1448_v0 = vadd.f32 %v1447_v13, %v1446_v61  ;;  %v903_v12 = vadd.f32 %v902_v14, %v838_v7 }
 0x11f   :  { %v1449_v1 = vpop.f32.mrf.mxu0 }
 0x120   :  { %v843_v3 = vadd.f32 %v1448_v0, %v778_v9  ;;  %v920_v23 = vadd.f32 %v919_v20, %v903_v12 }
 0x121   :  { %v1450_v10 = vpop.f32.mrf.mxu0 }
 0x122   :  { %v908_v21 = vadd.f32 %v1498_v28, %v843_v3  ;;  %v1451_v22 = vadd.f32 %v1450_v10, %v1449_v1 }
 0x123   :  { %v1518_v15 = vpop.f32.mrf.mxu0 }
 0x124   :  { %v846_v24 = vadd.f32 %v1451_v22, %v781_v19  ;;  %v921_v6 = vadd.f32 %v920_v23, %v908_v21 }
 0x125   :  { %v1102_v4 = vpop.f32.mrf.mxu0  ;;  %v1996_v26 = vpop.f32.mrf.mxu1 }
 0x126   :  { %v911_v25 = vadd.f32 %v1499_v56, %v846_v24 }
 0x127   :  { %v1519_v5 = vpop.f32.mrf.mxu0  ;;  %v1118_v27 = vpop.f32.mrf.mxu1 }
 0x128   :  { %v922_v8 = vadd.f32 %v921_v6, %v911_v25 }
 0x129   :  { %v1105_v29 = vpop.f32.mrf.mxu0  ;;  %v1523_v34 = vpop.f32.mrf.mxu1 }
 0x12a   :  { %v923_v30 = vrot.slane %v922_v8, 4  ;;  %v1135_v31 = vadd.f32 %v1105_v29, %v1102_v4 }
 0x12b   :  { %v1121_v38 = vpop.f32.mrf.mxu1 }
 0x12c   :  { %v924_v32 = vadd.f32 %v923_v30, %v922_v8  ;;  %v1136_v33 = vadd.f32 %v1518_v15, %v1135_v31 }
 0x12e   :  { %v925_v35 = vrot.slane %v924_v32, 2  ;;  %v1137_v28 = vadd.f32 %v1519_v5, %v1136_v33 }
 0x130   :  { %v926_v36 = vadd.f32 %v925_v35, %v924_v32  ;;  %v1138_v37 = vadd.f32 %v1137_v28, %v1118_v27 }
 0x132   :  { %v927_v39 = vrot.slane %v926_v36, 1  ;;  %v1139_v40 = vadd.f32 %v1138_v37, %v1121_v38 }
 0x134   :  { %v928_v41 = vadd.f32 %v927_v39, %v926_v36  ;;  %v1140_v42 = vadd.f32 %v1996_v26, %v1139_v40 }
 0x136   :  { %v930_v43 = vmul.f32 0.015625, %v928_v41  ;;  %v1141_v47 = vadd.f32 %v1523_v34, %v1140_v42 }
 0x138   :  { %v1999_v44 = vsub.f32 %v884_v57, %v930_v43  ;;  %v2001_v45 = vsub.f32 %v887_v50, %v930_v43  ;;  %v2003_v46 = vsub.f32 %v892_v58, %v930_v43  ;;  %v2005_v48 = vsub.f32 %v895_v63, %v930_v43 }
 0x139   :  { %v2011_v52 = vsub.f32 %v900_v18, %v930_v43  ;;  %v1142_v55 = vrot.slane %v1141_v47, 4  ;;  %v2015_v50 = vsub.f32 %v903_v12, %v930_v43  ;;  %v2019_v59 = vsub.f32 %v908_v21, %v930_v43 }
 0x13a   :  { %v939_v49 = vmul.f32 %v1999_v44, %v1999_v44  ;;  %v940_v51 = vmul.f32 %v2001_v45, %v2001_v45  ;;  %v941_v53 = vmul.f32 %v2003_v46, %v2003_v46  ;;  %v942_v56 = vmul.f32 %v2005_v48, %v2005_v48 }
 0x13b   :  { %v1143_v58 = vadd.f32 %v1142_v55, %v1141_v47  ;;  %v943_v60 = vmul.f32 %v2011_v52, %v2011_v52  ;;  %v2023_v63 = vsub.f32 %v911_v25, %v930_v43  ;;  %v944_v7 = vmul.f32 %v2015_v50, %v2015_v50 }
 0x13c   :  { %v947_v54 = vadd.f32 %v940_v51, %v939_v49  ;;  %v945_v13 = vmul.f32 %v2019_v59, %v2019_v59  ;;  %v965_v55 = vlaneseq }
 0x13d   :  { %v1144_v62 = vrot.slane %v1143_v58, 2  ;;  %v946_v17 = vmul.f32 %v2023_v63, %v2023_v63 }
 0x13e   :  { %v948_v57 = vadd.f32 %v947_v54, %v941_v53 }
 0x13f   :  { %v1145_v11 = vadd.f32 %v1144_v62, %v1143_v58 }
 0x140   :  { %v949_v61 = vadd.f32 %v948_v57, %v942_v56  ;;  %v966_v57 = vshrl.u32 %v965_v55, 7 }
 0x141   :  { %v1146_v16 = vrot.slane %v1145_v11, 1 }
 0x142   :  { %v950_v9 = vadd.f32 %v949_v61, %v943_v60  ;;  %v914_v60 = vld [vmem:[%s2115_s3] sm:$0x1]  ;;  %v967_v62 = vsub.s32 0, %v966_v57 }
 0x143   :  { %v1147_v0 = vadd.f32 %v1146_v16, %v1145_v11  ;;  %v1133_v11 = vld [vmem:[%s2116_s6] sm:$0x1] }
 0x144   :  { %v951_v14 = vadd.f32 %v950_v9, %v944_v7 }
 0x145   :  { %v1148_v2 = vmul.f32 0.015625, %v1147_v0 }
 0x146   :  { %v952_v18 = vadd.f32 %v951_v14, %v945_v13  ;;  %v1322_v13 = vld [vmem:[%s2117_s4] ss:$0 sm:$0xff] }
 0x147   :  { %v2031_v12 = vsub.f32 %v1102_v4, %v1148_v2  ;;  %v2033_v10 = vsub.f32 %v1105_v29, %v1148_v2  ;;  %v2035_v19 = vsub.f32 %v1518_v15, %v1148_v2  ;;  %v2037_v21 = vsub.f32 %v1519_v5, %v1148_v2 }
 0x148   :  { %v953_v1 = vadd.f32 %v952_v18, %v946_v17  ;;  %v2043_v6 = vsub.f32 %v1118_v27, %v1148_v2  ;;  %v2047_v29 = vsub.f32 %v1121_v38, %v1148_v2  ;;  %v2052_v30 = vsub.f32 %v1996_v26, %v1148_v2 }
 0x149   :  { %v1157_v22 = vmul.f32 %v2031_v12, %v2031_v12  ;;  %v1158_v23 = vmul.f32 %v2033_v10, %v2033_v10  ;;  %v1159_v4 = vmul.f32 %v2035_v19, %v2035_v19  ;;  %v1160_v15 = vmul.f32 %v2037_v21, %v2037_v21 }
 0x14a   :  { %v954_v3 = vrot.slane %v953_v1, 4  ;;  %v1161_v31 = vmul.f32 %v2043_v6, %v2043_v6  ;;  %v1156_v33 = vsub.f32 %v1523_v34, %v1148_v2  ;;  %v1162_v35 = vmul.f32 %v2047_v29, %v2047_v29 }
 0x14b   :  { %v1165_v25 = vadd.f32 %v1158_v23, %v1157_v22  ;;  %v1163_v36 = vmul.f32 %v2052_v30, %v2052_v30 }
 0x14c   :  { %v955_v20 = vadd.f32 %v954_v3, %v953_v1  ;;  %v1164_v39 = vmul.f32 %v1156_v33, %v1156_v33 }
 0x14d   :  { %v1166_v5 = vadd.f32 %v1165_v25, %v1159_v4 }
 0x14e   :  { %v956_v24 = vrot.slane %v955_v20, 2 }
 0x14f   :  { %v1167_v32 = vadd.f32 %v1166_v5, %v1160_v15 }
 0x150   :  { %v957_v8 = vadd.f32 %v956_v24, %v955_v20 }
 0x151   :  { %v1168_v28 = vadd.f32 %v1167_v32, %v1161_v31 }
 0x152   :  { %v958_v27 = vrot.slane %v957_v8, 1 }
 0x153   :  { %v1169_v37 = vadd.f32 %v1168_v28, %v1162_v35 }
 0x154   :  { %v959_v38 = vadd.f32 %v958_v27, %v957_v8 }
 0x155   :  { %v1170_v40 = vadd.f32 %v1169_v37, %v1163_v36 }
 0x156   :  { %v960_v26 = vmul.f32 0.015625, %v959_v38 }
 0x157   :  { %v1171_v41 = vadd.f32 %v1170_v40, %v1164_v39 }
 0x158   :  { %v961_v47 = vadd.f32 1e-05, %v960_v26 }
 0x159   :  { %v1172_v42 = vrot.slane %v1171_v41, 4 }
 0x15a   :  { %1644 = vrsqrt.f32 %v961_v47 }
 0x15b   :  { %v1173_v43 = vadd.f32 %v1172_v42, %v1171_v41 }
 0x15d   :  { %v1174_v49 = vrot.slane %v1173_v43, 2 }
 0x15f   :  { %v1175_v51 = vadd.f32 %v1174_v49, %v1173_v43 }
 0x161   :  { %v1176_v34 = vrot.slane %v1175_v51, 1 }
 0x163   :  { %v1177_v53 = vadd.f32 %v1176_v34, %v1175_v51 }
 0x165   :  { %v1178_v54 = vmul.f32 0.015625, %v1177_v53 }
 0x167   :  { %v1179_v56 = vadd.f32 1e-05, %v1178_v54  ;;  %v1645_v58 = vpop.eup %1644 }
 0x168   :  { %v963_v61 = vmul.f32 %v1645_v58, %v914_v60 }
 0x169   :  { %1646 = vrsqrt.f32 %v1179_v56 }
 0x16a   :  { %v968_v7 = vrot.slane %v963_v61, %v967_v62 }
 0x16c   :  { %v977_v9 = vmul.f32 %v968_v7, %v2023_v63  ;;  %v976_v14 = vmul.f32 %v968_v7, %v2019_v59  ;;  %v970_v16 = vmul.f32 %v968_v7, %v1999_v44  ;;  %v971_v17 = vmul.f32 %v968_v7, %v2001_v45  ;;  %v1331_v45 = vld [vmem:[%s2118_s7] ss:$0 sm:$0xff] }
 0x16d   :  { %v972_v0 = vmul.f32 %v968_v7, %v2003_v46  ;;  %v973_v1 = vmul.f32 %v968_v7, %v2005_v48  ;;  %v974_v63 = vmul.f32 %v968_v7, %v2011_v52  ;;  %v975_v2 = vmul.f32 %v968_v7, %v2015_v50 }
 0x16e   :  { %v991_v20 = vadd.f32 %v1322_v13, %v977_v9  ;;  %v984_v22 = vadd.f32 %v1322_v13, %v970_v16  ;;  %v985_v23 = vadd.f32 %v1322_v13, %v971_v17  ;;  %v990_v24 = vadd.f32 %v1322_v13, %v976_v14 }
 0x16f   :  { %v986_v59 = vadd.f32 %v1322_v13, %v972_v0  ;;  %v987_v25 = vadd.f32 %v1322_v13, %v973_v1  ;;  %v988_v44 = vadd.f32 %v1322_v13, %v974_v63  ;;  %v989_v8 = vadd.f32 %v1322_v13, %v975_v2 }
 0x176   :  { %v1647_v18 = vpop.eup %1646 }
 0x177   :  { %v1181_v3 = vmul.f32 %v1647_v18, %v1133_v11 }
 0x179   :  { %v1186_v4 = vrot.slane %v1181_v3, %v967_v62 }
 0x17b   :  { %v1188_v46 = vmul.f32 %v1186_v4, %v2031_v12  ;;  %v1189_v48 = vmul.f32 %v1186_v4, %v2033_v10  ;;  %v1190_v52 = vmul.f32 %v1186_v4, %v2035_v19  ;;  %v1191_v50 = vmul.f32 %v1186_v4, %v2037_v21 }
 0x17c   :  { %v1192_v15 = vmul.f32 %v1186_v4, %v2043_v6  ;;  %v1193_v5 = vmul.f32 %v1186_v4, %v2047_v29  ;;  %v1194_v31 = vmul.f32 %v1186_v4, %v2052_v30  ;;  %v1195_v32 = vmul.f32 %v1186_v4, %v1156_v33 }
 0x17d   :  { %v1202_v27 = vadd.f32 %v1331_v45, %v1188_v46  ;;  %v1203_v35 = vadd.f32 %v1331_v45, %v1189_v48  ;;  %v1204_v28 = vadd.f32 %v1331_v45, %v1190_v52  ;;  %v1205_v36 = vadd.f32 %v1331_v45, %v1191_v50 }
 0x17e   :  { %v1206_v37 = vadd.f32 %v1331_v45, %v1192_v15  ;;  %v1207_v38 = vadd.f32 %v1331_v45, %v1193_v5  ;;  %v1208_v12 = vadd.f32 %v1331_v45, %v1194_v31  ;;  %v1209_v39 = vadd.f32 %v1331_v45, %v1195_v32 }
 0x17f   :  { %v1210_v10 = vadd.f32 %v1202_v27, %v984_v22  ;;  %v1211_v40 = vadd.f32 %v1203_v35, %v985_v23  ;;  %v1212_v19 = vadd.f32 %v1204_v28, %v986_v59  ;;  %v1213_v41 = vadd.f32 %v1205_v36, %v987_v25 }
 0x180   :  { %v1214_v21 = vadd.f32 %v1206_v37, %v988_v44  ;;  %v1215_v26 = vadd.f32 %v1207_v38, %v989_v8  ;;  %v1216_v6 = vadd.f32 %v1208_v12, %v990_v24  ;;  %v1217_v42 = vadd.f32 %v1209_v39, %v991_v20 }
 0x181   :  { %v1218_v29 = vmax.f32 %v1210_v10, 0.0  ;;  %v1219_v43 = vmax.f32 %v1211_v40, 0.0  ;;  %v1220_v30 = vmax.f32 %v1212_v19, 0.0  ;;  %v1221_v33 = vmax.f32 %v1213_v41, 0.0 }
 0x182   :  { %v1222_v47 = vmax.f32 %v1214_v21, 0.0  ;;  %v1223_v49 = vmax.f32 %v1215_v26, 0.0  ;;  %v1224_v51 = vmax.f32 %v1216_v6, 0.0  ;;  %v1225_v34 = vmax.f32 %v1217_v42, 0.0 }
 0x183   :  { %1226 = vst [vmem:[%s2119_s8] sm:$0xff] %v1218_v29  ;;  %1227 = vst [vmem:[%s2119_s8 + $0x8] sm:$0xff] %v1219_v43 }
 0x184   :  { %1228 = vst [vmem:[%s2119_s8 + $0x10] sm:$0xff] %v1220_v30  ;;  %1229 = vst [vmem:[%s2119_s8 + $0x18] sm:$0xff] %v1221_v33 }
 0x185   :  { %1230 = vst [vmem:[%s2119_s8 + $0x20] sm:$0xff] %v1222_v47  ;;  %1231 = vst [vmem:[%s2119_s8 + $0x28] sm:$0xff] %v1223_v49 }
 0x186   :  { %1232 = vst [vmem:[%s2119_s8 + $0x30] sm:$0xff] %v1224_v51  ;;  %1233 = vst [vmem:[%s2119_s8 + $0x38] sm:$0xff] %v1225_v34 }

</bundles_post_ra>
